<compile_context>
chip_gen: v7x
topology: tpu7x:2x2x1
jax: 0.10.0
libtpu: 0.0.40
codegen_flags: <defaults>
</compile_context>

<pallas_src>
import jax
import jax.numpy as jnp
from jax.experimental import pallas as pl
from jax.experimental.pallas import tpu as pltpu

EPS = 1e-5


def make_sac_kernel(n_layers, n_in, out_sz, y_lo, y_hi):
    """Kernel body: (n_layers-1) hidden matmul+bias+ReLU layers + output head.

    Refs: x_ref (TB, n_in), w_ref (L, P, P), b_ref (L, 1, P), o_ref (TB, out_sz).
    BN affines are pre-folded into (W, b); padded rows/cols are zero, so
    ReLU(0 + 0) = 0 keeps the padded lanes inert through the whole chain.
    """

    def kernel(x_ref, w_ref, b_ref, o_ref):
        wd = w_ref.dtype
        P = w_ref.shape[2]
        h = x_ref[...]          # (TB, n_in) — natural width, no padded DMA bytes
        kdim = n_in             # contraction width of the current layer's weight
        # Hidden layers: MXU matmul (f32 accumulation) + bias + ReLU (f32).
        for i in range(n_layers - 1):
            h = jnp.dot(h.astype(wd), w_ref[i, :kdim, :],
                        preferred_element_type=jnp.float32)
            h = jnp.maximum(h + b_ref[i], 0.0)
            kdim = P            # after layer 1, h is P wide (zero-padded lanes)
        # Output head: matmul + bias, keep only the real columns, sigmoid, rescale.
        o = jnp.dot(h.astype(wd), w_ref[n_layers - 1, :kdim, :],
                    preferred_element_type=jnp.float32)
        o = o + b_ref[n_layers - 1]
        o = o[:, :out_sz]       # static lane slice -> narrow (TB, out_sz) store
        o = jax.nn.sigmoid(o)
        o_ref[...] = (o * (y_hi - y_lo) + y_lo).astype(o_ref.dtype)

    return kernel


def fold_sac_params(in_scale, in_shift, layer_params, w_out, b_out):
    """Fold all eval-mode BN affines into the adjacent Linear layers.

    in_scale / in_shift: (n_in,) affine applied to raw concat(x_emb, x_cont)
      (identity on the embedding part, folded BN0 on the continuous part).
    layer_params: list of (W, b, bn_scale, bn_shift); W is (in, out).
    Returns a list of (W', b') for every layer including the output head, such
    that the forward is exactly matmul + bias (+ ReLU between layers).
    """
    folded = []
    scale, shift = in_scale, in_shift
    for (w, b, s, t) in layer_params:
        folded.append((scale[:, None] * w, shift @ w + b.reshape(-1)))
        scale, shift = s.reshape(-1), t.reshape(-1)
    folded.append((scale[:, None] * w_out, shift @ w_out + b_out.reshape(-1)))
    return folded


def sac_forward_pallas(x_raw, folded_layers, y_range, *,
                       block_batch=2048, compute_dtype=jnp.bfloat16,
                       out_dtype=jnp.float32):
    """Runs the (BN-folded) SACModel MLP in one batch-tiled Pallas kernel.

    x_raw: (B, n_in) f32 = concat(x_emb, x_cont) — raw features, BN0 already
    folded into the first layer's weights. Only a dtype cast is applied on the
    host (no zero-pad / no extra HBM pass).
    """
    B, n_in = x_raw.shape
    dims = [n_in] + [w.shape[1] for (w, _) in folded_layers]
    out_sz = dims[-1]
    L = len(folded_layers)

    # Common padded footprint so all layers share one packed weight slab.
    P = ((max(dims) + 15) // 16) * 16     # sublane-friendly for f32 and bf16

    w_pack = jnp.zeros((L, P, P), jnp.float32)
    b_pack = jnp.zeros((L, 1, P), jnp.float32)
    for i, (w, b) in enumerate(folded_layers):
        k, n = w.shape
        w_pack = w_pack.at[i, :k, :n].set(w)
        b_pack = b_pack.at[i, 0, :n].set(b)
    w_pack = w_pack.astype(compute_dtype)   # weights on the wire in compute dtype
    # biases stay f32: added to the f32 accumulator

    # Batch tile: large (amortize ~0.35us/step), multiple of 16, no feature-dim
    # padding. Narrow widths => even TB in the thousands is only ~hundreds of KiB.
    TB = min(int(block_batch), B)
    TB = max(16, ((TB + 15) // 16) * 16)
    n_tiles = pl.cdiv(B, TB)                # ragged last tile handled by Pallas
                                            # (masked writeback of partial blocks)

    x = x_raw.astype(compute_dtype)         # cast only; no host-side pad pass

    kernel = make_sac_kernel(L, n_in, out_sz,
                             float(y_range[0]), float(y_range[1]))

    out = pl.pallas_call(
        kernel,
        out_shape=jax.ShapeDtypeStruct((B, out_sz), out_dtype),
        grid=(n_tiles,),
        in_specs=[
            pl.BlockSpec((TB, n_in), lambda i: (i, 0)),     # natural-width x tile
            pl.BlockSpec((L, P, P), lambda i: (0, 0, 0)),   # packed weights (resident)
            pl.BlockSpec((L, 1, P), lambda i: (0, 0, 0)),   # packed biases (resident)
        ],
        out_specs=pl.BlockSpec((TB, out_sz), lambda i: (i, 0)),  # narrow output
        compiler_params=pltpu.CompilerParams(
            dimension_semantics=("parallel",),   # v7x: shard batch over both TCs
            vmem_limit_bytes=32 * 1024 * 1024,   # explicit, safe on v5e/v6e/v7x
        ),
    )(x, w_pack, b_pack)

    return out


if __name__ == "__main__":
    # --- deterministic synthetic config (matches SACModel.__init__ shapes) ---
    B = 64
    emb_szs = [(10, 4), (8, 3), (6, 5)]   # (cardinality, emb_dim)
    n_cont = 4
    szs = [32, 16]                        # hidden layer sizes
    out_sz = 1
    y_range = (0.0, 5.0)

    n_emb = sum(s for _, s in emb_szs)
    dims = [n_emb + n_cont] + szs

    key = jax.random.PRNGKey(0)
    keys = iter(jax.random.split(key, 128))

    def nrm(shape, scale=0.1):
        return jax.random.normal(next(keys), shape, jnp.float32) * scale

    def uni(shape, lo=0.5, hi=1.5):
        return jax.random.uniform(next(keys), shape, jnp.float32, lo, hi)

    # Embedding tables.
    emb_tables = [nrm((c, s)) for c, s in emb_szs]

    # BatchNorm1d(n_cont) params + running stats (eval mode), folded to affine.
    g0, be0, m0, v0 = uni((1, n_cont)), nrm((1, n_cont)), nrm((1, n_cont)), uni((1, n_cont))
    s0 = g0 / jnp.sqrt(v0 + EPS)
    t0 = be0 - m0 * s0

    # Hidden layers: Linear(dims[i] -> dims[i+1]) + BatchNorm1d(dims[i+1]).
    layer_params = []
    ref_layers = []
    for i in range(len(dims) - 1):
        W = nrm((dims[i], dims[i + 1]))
        b = nrm((1, dims[i + 1]))
        g = uni((1, dims[i + 1]))
        be = nrm((1, dims[i + 1]))
        m = nrm((1, dims[i + 1]))
        v = uni((1, dims[i + 1]))
        s = g / jnp.sqrt(v + EPS)
        t = be - m * s
        layer_params.append((W, b, s, t))
        ref_layers.append((W, b, g, be, m, v))

    # Output head Linear(szs[-1] -> out_sz).
    W_out = nrm((dims[-1], out_sz))
    b_out = nrm((1, out_sz))

    # --- inputs ---
    x_cat = jnp.stack(
        [jax.random.randint(next(keys), (B,), 0, c) for c, _ in emb_szs], axis=1)
    x_cont = jax.random.normal(next(keys), (B, n_cont), jnp.float32)

    # Glue: embedding gather + concat (emb_drop is identity in eval mode).
    x_emb = jnp.concatenate(
        [emb_tables[i][x_cat[:, i]] for i in range(len(emb_szs))], axis=1)
    x_raw = jnp.concatenate([x_emb, x_cont], axis=1)

    # --- host-side folding of all BN affines into the Linears ---
    in_scale = jnp.concatenate([jnp.ones((n_emb,), jnp.float32), s0.reshape(-1)])
    in_shift = jnp.concatenate([jnp.zeros((n_emb,), jnp.float32), t0.reshape(-1)])
    folded = fold_sac_params(in_scale, in_shift, layer_params, W_out, b_out)

    # --- pure-JAX reference (unfused, matches the PyTorch module in eval mode) ---
    def reference():
        x2 = (x_cont - m0) / jnp.sqrt(v0 + EPS) * g0 + be0
        x = jnp.concatenate([x_emb, x2], axis=1)
        for (W, b, g, be, m, v) in ref_layers:
            x = jnp.maximum(x @ W + b, 0.0)
            x = (x - m) / jnp.sqrt(v + EPS) * g + be
        x = x @ W_out + b_out
        x = jax.nn.sigmoid(x) * (y_range[1] - y_range[0]) + y_range[0]
        return x

    ref = jax.block_until_ready(reference())

    # --- f32-on-the-wire path (tight tolerance), 2 batch tiles of 32 ---
    out_f32 = sac_forward_pallas(x_raw, folded, y_range, block_batch=32,
                                 compute_dtype=jnp.float32)
    out_f32 = jax.block_until_ready(out_f32)
    assert out_f32.shape == (B, out_sz), out_f32.shape
    assert jnp.allclose(out_f32, ref, atol=1e-4, rtol=1e-4), (out_f32, ref)

    # --- bf16-on-the-wire default path (weights + x bf16, f32 accumulation).
    # bf16 input cast (~8 mantissa bits) is why the looser tolerance is needed;
    # acceptable for this sigmoid-bounded head and halves the dominant DMA bytes.
    out_bf16 = sac_forward_pallas(x_raw, folded, y_range, block_batch=32)
    out_bf16 = jax.block_until_ready(out_bf16)
    assert out_bf16.shape == (B, out_sz), out_bf16.shape
    assert jnp.allclose(out_bf16, ref, atol=0.1), (out_bf16, ref)

    print("KERNEL_OK")
</pallas_src>

<mosaic_0001>
module attributes {stable_mosaic.version = 11 : i64} {
  func.func @kernel(%arg0: i32, %arg1: memref<32x16xf32, #tpu.memory_space<vmem>>, %arg2: memref<3x32x32xf32, #tpu.memory_space<vmem>>, %arg3: memref<3x1x32xf32, #tpu.memory_space<vmem>>, %arg4: memref<32x1xf32, #tpu.memory_space<vmem>>) attributes {dimension_semantics = [#tpu.dimension_semantics<parallel>], iteration_bounds = array<i64: 2>, scalar_prefetch = 0 : i64, scratch_operands = 0 : i64, tpu.core_type = #tpu.core_type<tc>, window_params = [{transform_indices = @transform_0, window_bounds = array<i64: 32, 16>}, {pipeline_mode = #tpu.pipeline_mode<synchronous>, transform_indices = @transform_1, window_bounds = array<i64: 3, 32, 32>}, {pipeline_mode = #tpu.pipeline_mode<synchronous>, transform_indices = @transform_2, window_bounds = array<i64: 3, 1, 32>}, {transform_indices = @transform_3, window_bounds = array<i64: 32, 1>}]} {
    %c0 = arith.constant 0 : index
    %c0_0 = arith.constant 0 : index
    %0 = vector.load %arg1[%c0, %c0_0] : memref<32x16xf32, #tpu.memory_space<vmem>>, vector<32x16xf32>
    %c0_1 = arith.constant 0 : index
    %c0_2 = arith.constant 0 : index
    %c0_3 = arith.constant 0 : index
    %1 = vector.load %arg2[%c0_1, %c0_2, %c0_3] : memref<3x32x32xf32, #tpu.memory_space<vmem>>, vector<1x16x32xf32>
    %2 = vector.shape_cast %1 : vector<1x16x32xf32> to vector<16x32xf32>
    %cst = arith.constant dense<0.000000e+00> : vector<32x32xf32>
    %3 = tpu.matmul %0, %2, %cst {dimension_numbers = #tpu.dot_dimension_numbers<[1], [0], [0], [1], [0, 0, 1, 1], [], []>} : vector<32x16xf32>, vector<16x32xf32>, vector<32x32xf32> -> vector<32x32xf32>
    %c0_4 = arith.constant 0 : index
    %c0_5 = arith.constant 0 : index
    %c0_6 = arith.constant 0 : index
    %4 = vector.load %arg3[%c0_4, %c0_5, %c0_6] : memref<3x1x32xf32, #tpu.memory_space<vmem>>, vector<1x1x32xf32>
    %5 = vector.shape_cast %4 : vector<1x1x32xf32> to vector<1x32xf32>
    %6 = vector.broadcast %5 : vector<1x32xf32> to vector<32x32xf32>
    %7 = arith.addf %3, %6 : vector<32x32xf32>
    %cst_7 = arith.constant 0.000000e+00 : f32
    %8 = vector.broadcast %cst_7 : f32 to vector<32x32xf32>
    %9 = arith.maximumf %7, %8 : vector<32x32xf32>
    %c1 = arith.constant 1 : index
    %c0_8 = arith.constant 0 : index
    %c0_9 = arith.constant 0 : index
    %10 = vector.load %arg2[%c1, %c0_8, %c0_9] : memref<3x32x32xf32, #tpu.memory_space<vmem>>, vector<1x32x32xf32>
    %11 = vector.shape_cast %10 : vector<1x32x32xf32> to vector<32x32xf32>
    %cst_10 = arith.constant dense<0.000000e+00> : vector<32x32xf32>
    %12 = tpu.matmul %9, %11, %cst_10 {dimension_numbers = #tpu.dot_dimension_numbers<[1], [0], [0], [1], [0, 0, 1, 1], [], []>} : vector<32x32xf32>, vector<32x32xf32>, vector<32x32xf32> -> vector<32x32xf32>
    %c1_11 = arith.constant 1 : index
    %c0_12 = arith.constant 0 : index
    %c0_13 = arith.constant 0 : index
    %13 = vector.load %arg3[%c1_11, %c0_12, %c0_13] : memref<3x1x32xf32, #tpu.memory_space<vmem>>, vector<1x1x32xf32>
    %14 = vector.shape_cast %13 : vector<1x1x32xf32> to vector<1x32xf32>
    %15 = vector.broadcast %14 : vector<1x32xf32> to vector<32x32xf32>
    %16 = arith.addf %12, %15 : vector<32x32xf32>
    %cst_14 = arith.constant 0.000000e+00 : f32
    %17 = vector.broadcast %cst_14 : f32 to vector<32x32xf32>
    %18 = arith.maximumf %16, %17 : vector<32x32xf32>
    %c2 = arith.constant 2 : index
    %c0_15 = arith.constant 0 : index
    %c0_16 = arith.constant 0 : index
    %19 = vector.load %arg2[%c2, %c0_15, %c0_16] : memref<3x32x32xf32, #tpu.memory_space<vmem>>, vector<1x32x32xf32>
    %20 = vector.shape_cast %19 : vector<1x32x32xf32> to vector<32x32xf32>
    %cst_17 = arith.constant dense<0.000000e+00> : vector<32x32xf32>
    %21 = tpu.matmul %18, %20, %cst_17 {dimension_numbers = #tpu.dot_dimension_numbers<[1], [0], [0], [1], [0, 0, 1, 1], [], []>} : vector<32x32xf32>, vector<32x32xf32>, vector<32x32xf32> -> vector<32x32xf32>
    %c2_18 = arith.constant 2 : index
    %c0_19 = arith.constant 0 : index
    %c0_20 = arith.constant 0 : index
    %22 = vector.load %arg3[%c2_18, %c0_19, %c0_20] : memref<3x1x32xf32, #tpu.memory_space<vmem>>, vector<1x1x32xf32>
    %23 = vector.shape_cast %22 : vector<1x1x32xf32> to vector<1x32xf32>
    %24 = vector.broadcast %23 : vector<1x32xf32> to vector<32x32xf32>
    %25 = arith.addf %21, %24 : vector<32x32xf32>
    %26 = vector.extract_strided_slice %25 {offsets = [0, 0], sizes = [32, 1], strides = [1, 1]} : vector<32x32xf32> to vector<32x1xf32>
    %27 = arith.negf %26 : vector<32x1xf32>
    %28 = math.exp %27 : vector<32x1xf32>
    %cst_21 = arith.constant 1.000000e+00 : f32
    %29 = vector.broadcast %cst_21 : f32 to vector<32x1xf32>
    %30 = arith.addf %29, %28 : vector<32x1xf32>
    %31 = arith.divf %29, %30 : vector<32x1xf32>
    %cst_22 = arith.constant 5.000000e+00 : f32
    %32 = vector.broadcast %cst_22 : f32 to vector<32x1xf32>
    %33 = arith.mulf %31, %32 : vector<32x1xf32>
    %cst_23 = arith.constant 0.000000e+00 : f32
    %34 = vector.broadcast %cst_23 : f32 to vector<32x1xf32>
    %35 = arith.addf %33, %34 : vector<32x1xf32>
    %c0_24 = arith.constant 0 : index
    %c0_25 = arith.constant 0 : index
    %36 = vector.load %arg4[%c0_24, %c0_25] : memref<32x1xf32, #tpu.memory_space<vmem>>, vector<32x1xf32>
    tpu.vector_store %arg4[%c0_24, %c0_25], %35 {strides = array<i32>} : memref<32x1xf32, #tpu.memory_space<vmem>>, vector<32x1xf32>,
    return
  }
  func.func @transform_0(%arg0: i32) -> (i32, i32) {
    %c0_i32 = arith.constant 0 : i32
    %c0_i32_0 = arith.constant 0 : i32
    return %arg0, %c0_i32 : i32, i32
  }
  func.func @transform_1(%arg0: i32) -> (i32, i32, i32) {
    %c0_i32 = arith.constant 0 : i32
    %c0_i32_0 = arith.constant 0 : i32
    %c0_i32_1 = arith.constant 0 : i32
    %c0_i32_2 = arith.constant 0 : i32
    return %c0_i32, %c0_i32_0, %c0_i32_1 : i32, i32, i32
  }
  func.func @transform_2(%arg0: i32) -> (i32, i32, i32) {
    %c0_i32 = arith.constant 0 : i32
    %c0_i32_0 = arith.constant 0 : i32
    %c0_i32_1 = arith.constant 0 : i32
    %c0_i32_2 = arith.constant 0 : i32
    return %c0_i32, %c0_i32_0, %c0_i32_1 : i32, i32, i32
  }
  func.func @transform_3(%arg0: i32) -> (i32, i32) {
    %c0_i32 = arith.constant 0 : i32
    %c0_i32_0 = arith.constant 0 : i32
    return %arg0, %c0_i32 : i32, i32
  }
}

</mosaic_0001>

<bundles_post_ra>
// kernel: tpu_custom_call.1
= control target key start
LH: loop header
LB: loop body
LE: loop exit
PB: predicated region body
PF: predicated region fallthrough
CT: control target
= control target key end

     0   :  { %8 = vsyncpa [#allocation3], 0  ;;  %s848_s12 = smov 0   ;;  %s935_s0 = inlined_call_operand.vmem [shape: f32[64,16], index: 0, kind: input, shape index: {}]   ;;  %s936_s1 = inlined_call_operand.hbm [shape: f32[3,32,32], index: 1, kind: input, shape index: {}]   ;;  %s937_s2 = inlined_call_operand.vmem [shape: f32[3,1,32], index: 2, kind: input, shape index: {}]   ;;  %s938_s3 = inlined_call_operand.vmem [shape: f32[64,1], index: 3, kind: output, shape index: {}]  }
   0x1 LB: > { %s634_s13 = sadd.s32 4294967295, %s823_s12   ;;  %p636_p0 = scmp.ge.s32.totalorder %s823_s12, 1  ;;  %s823_s12 = sphi %s848_s12, %s14_s12  }
   0x2   : > { %p113_p1 = scmp.lt.s32.totalorder %s823_s12, 3  ;;  %s825_s14 = smov [#allocation2]  }
   0x3   : > { %s125_s15 = sshll.u32 %s825_s14, 4  ;;  %p862_p3 = scmp.eq.s32.totalorder %s634_s13, 0  ;;  %s126_s15 = int_to_ptr.vmem [resolvable:$true] %s125_s15 }
   0x4   : > { %p856_p2 = pnand %p636_p0, %p113_p1  ;;  %s785_s21 = scalar_lea.hbm %s936_s1, 1536 }
   0x5   : > { %s943_s17 = scalar_select %p862_p3, 1, 0 }
   0x6   : > { %s942_s16 = scalar_select %p856_p2, 1, 0 }
   0x7   : > { %p752_p4 = pneg %p856_p2  ;;  %p786_p6 = scmp.ne.s32.totalorder %s936_s1, %s785_s21 }
   0x8   : > { %p792_p10 = scmp.lt.u32.totalorder %s785_s21, %s936_s1 }
   0x9   : > { %p870_p5 = pnand %p862_p3, %p752_p4 }
   0xb   : > { %p787_p7 = pneg %p870_p5 }
   0xd   : > { %p788_p8 = pnand %p787_p7, %p786_p6 }
   0xf   : > { %p789_p9 = pneg %p788_p8 }
  0x11   : > { %p794_p11 = pnand %p792_p10, %p789_p9 }
  0x13   : > { %797 = shalt.err (!%p794_p11)
}
  0x14   : > { %s798_s26 = scalar_lea.vmem %s126_s15, 1536  ;;  %p806_p1 = scmp.lt.s32.totalorder %s126_s15, %s126_s15 }
  0x15   : > { %p799_p12 = scmp.ne.s32.totalorder %s126_s15, %s798_s26  ;;  %p807_p4 = scmp.lt.s32.totalorder %s798_s26, %s798_s26 }
  0x17   : > { %p801_p13 = pnand %p799_p12, %p787_p7  ;;  %p808_p3 = por %p807_p4, %p806_p1 }
  0x19   : > { %p802_p0 = pneg %p801_p13 }
  0x1b   : > { %p809_p2 = pnand %p808_p3, %p802_p0 }
  0x1d   : > { %812 = shalt.err (!%p809_p2)
}
  0x1e   : > { %s826_s27 = smov 128   ;;  %s827_s28 = smov 8  }
  0x1f   : > { %755 = dma.hbm_to_vmem [thread:$0]  (!%p870_p5), %s936_s1, 1536, %s126_s15, [#allocation3], %s826_s27, %s826_s27, %s827_s28  }
  0x20   : > { %p945_p6 = scmp.ne.s32.totalorder %s942_s16, 0 }
  0x21   : > { %p946_p8 = scmp.ne.s32.totalorder (!%p945_p6), %s943_s17, 0 }
  0x22   : > { %153 = sbr.rel (%p945_p6) target bundleno = 734 (0x2de), region = 32 }
  0x29   : > { %818 = dma.done.wait (%p946_p8), [#allocation3], 1536  }
  0x2a   : > { %820 = vsyncadd (%p946_p8), [#allocation3], 4294965760  ;;  %s641_s4 = sshll.u32 %s634_s13, 2  ;;  %vm202_vm0 = vcmask 130048   ;;  %v193_v0 = vld [vmem:[#allocation2] sm:$0xff]  ;;  %v194_v1 = vld [vmem:[#allocation2 + $0x8] sm:$0xff] }
  0x2b   : > { %p178_p2 = scmp.lt.s32.totalorder %s641_s4, 7  ;;  %v728_v3 = vpack.c.bf16 %v194_v1, %v193_v0  ;;  %v305_v4 = vld [vmem:[#allocation2 + $0x20] sm:$0xff]  ;;  %v306_v5 = vld [vmem:[#allocation2 + $0x28] sm:$0xff]  ;;  %v307_v10 = vld [vmem:[#allocation2 + $0x30] sm:$0xff]  ;;  %vm317_vm1 = vcmask 261120   ;;  %vm561_vm2 = vcmask 7168  }
  0x2c   : > { %v732_v6 = vpack.c.bf16 %v306_v5, %v305_v4  ;;  %v308_v11 = vld [vmem:[#allocation2 + $0x38] sm:$0xff]  ;;  %v420_v13 = vld [vmem:[#allocation2 + $0x40] sm:$0xff]  ;;  %v421_v14 = vld [vmem:[#allocation2 + $0x48] sm:$0xff] }
  0x2d   : > { %s948_s4 = smov (!%p178_p2, %s641_s4), 7  ;;  %729 = vmatprep.subr.bf16.mxu0 %v728_v3  ;;  %v736_v12 = vpack.c.bf16 %v308_v11, %v307_v10  ;;  %v740_v15 = vpack.c.bf16 %v421_v14, %v420_v13  ;;  %v645_v16 = vld [vmem:[%s937_s2] ss:$0 sm:$0xff]  ;;  %v422_v29 = vld [vmem:[#allocation2 + $0x50] sm:$0xff]  ;;  %v423_v30 = vld [vmem:[#allocation2 + $0x58] sm:$0xff] }
  0x2e   : > { %s642_s5 = sshll.u32 %s948_s4, 3  ;;  %731 = vmatpush3.bf16.msra.mxu0 %v728_v3  ;;  %733 = vmatprep.subr.bf16.mxu1 %v732_v6  ;;  %v744_v31 = vpack.c.bf16 %v423_v30, %v422_v29  ;;  %v651_v32 = vld [vmem:[%s937_s2 + $0x1] ss:$0 sm:$0xff]  ;;  %v657_v45 = vld [vmem:[%s937_s2 + $0x2] ss:$0 sm:$0xff] }
  0x2f   : > { %s181_s8 = scalar_lea.vmem %s935_s0, %s642_s5  ;;  %735 = vmatpush3.bf16.msra.mxu1 %v732_v6  ;;  %741 = vmatprep.subr.bf16.mxu0 %v740_v15  ;;  %s187_s18 = scalar_lea.vmem %s938_s3, %s642_s5 }
  0x30   : > { %v189_v2 = vld [vmem:[%s181_s8] sm:$0xff]  ;;  %v190_v7 = vld [vmem:[%s181_s8 + $0x8] sm:$0xff]  ;;  %v191_v8 = vld [vmem:[%s181_s8 + $0x10] sm:$0xff]  ;;  %737 = vmatprep.subr.bf16.mxu1 %v736_v12 }
  0x31   : > { %694 = vmatprep.mubr.msk.f32.mxu0 %vm202_vm0, %v189_v2  ;;  %v192_v9 = vld [vmem:[%s181_s8 + $0x18] sm:$0xff] }
  0x32   : > { %695 = vmatmul.mubr.msk.f32.vlgmr.msra.gmra.mrb[0].mxu0 %vm202_vm0, %v190_v7 }
  0x33   : > { %697 = vmatprep.mubr.msk.f32.mxu0 %vm202_vm0, %v191_v8  ;;  %739 = vmatpush3.bf16.msra.mxu1 %v736_v12 }
  0x34   : > { %743 = vmatpush3.bf16.msra.mxu0 %v740_v15 }
  0x35   : > { %745 = vmatprep.subr.bf16.mxu0 %v744_v31 }
  0x36   : > { %698 = vmatmul.mubr.msk.f32.gmra.mrb[2].mxu0 %vm202_vm0, %v192_v9 }
  0x38   : > { %747 = vmatpush3.bf16.msra.mxu0 %v744_v31 }
 0x105   : > { %v696_v17 = vpop.f32.mrb[0].mxu0 }
 0x106   : > { %v287_v18 = vadd.f32 %v696_v17, %v645_v16  ;;  %v281_v19 = vpop.f32.mrb[1].mxu0 }
 0x107   : > { %v282_v20 = vadd.f32 %v645_v16, %v281_v19 }
 0x108   : > { %v301_v23 = vmax.f32 %v287_v18, 0.0 }
 0x109   : > { %v300_v21 = vmax.f32 %v282_v20, 0.0  ;;  %v699_v22 = vpop.f32.mrb[2].mxu0 }
 0x10a   : > { %v297_v24 = vadd.f32 %v699_v22, %v645_v16  ;;  %v291_v25 = vpop.f32.mrb[3].mxu0 }
 0x10b   : > { %v292_v26 = vadd.f32 %v645_v16, %v291_v25  ;;  %708 = vmatprep.mubr.msk.f32.mxu1 %vm317_vm1, %v300_v21 }
 0x10c   : > { %709 = vmatmul.mubr.msk.f32.vlgmr.msra.gmra.mrb[0].mxu1 %vm317_vm1, %v301_v23  ;;  %v303_v28 = vmax.f32 %v297_v24, 0.0 }
 0x10d   : > { %v302_v27 = vmax.f32 %v292_v26, 0.0 }
 0x10f   : > { %711 = vmatprep.mubr.msk.f32.mxu1 %vm317_vm1, %v302_v27 }
 0x110   : > { %712 = vmatmul.mubr.msk.f32.gmra.mrb[2].mxu1 %vm317_vm1, %v303_v28 }
 0x1df   : > { %v710_v33 = vpop.f32.mrb[0].mxu1 }
 0x1e0   : > { %v402_v34 = vadd.f32 %v710_v33, %v651_v32  ;;  %v396_v35 = vpop.f32.mrb[1].mxu1 }
 0x1e1   : > { %v397_v36 = vadd.f32 %v651_v32, %v396_v35 }
 0x1e2   : > { %v416_v39 = vmax.f32 %v402_v34, 0.0 }
 0x1e3   : > { %v415_v37 = vmax.f32 %v397_v36, 0.0  ;;  %v713_v38 = vpop.f32.mrb[2].mxu1 }
 0x1e4   : > { %v412_v40 = vadd.f32 %v713_v38, %v651_v32  ;;  %v406_v41 = vpop.f32.mrb[3].mxu1 }
 0x1e5   : > { %v407_v42 = vadd.f32 %v651_v32, %v406_v41  ;;  %722 = vmatprep.mubr.msk.f32.mxu0 %vm317_vm1, %v415_v37 }
 0x1e6   : > { %723 = vmatmul.mubr.msk.f32.vlgmr.msra.gmra.mrb[4].mxu0 %vm317_vm1, %v416_v39  ;;  %v418_v44 = vmax.f32 %v412_v40, 0.0 }
 0x1e7   : > { %v417_v43 = vmax.f32 %v407_v42, 0.0 }
 0x1e9   : > { %725 = vmatprep.mubr.msk.f32.mxu0 %vm317_vm1, %v417_v43 }
 0x1ea   : > { %726 = vmatmul.mubr.msk.f32.gmra.mrb[6].mxu0 %vm317_vm1, %v418_v44 }
 0x2b9   : > { %v724_v46 = vpop.f32.mrb[4].mxu0 }
 0x2ba   : > { %v516_v47 = vadd.f32 %v724_v46, %v657_v45  ;;  %v510_v48 = vpop.f32.mrb[5].mxu0 }
 0x2bb   : > { %v511_v49 = vadd.f32 %v657_v45, %v510_v48 }
 0x2bc   : > { %v663_v50 = vmul.f32 -1.442695, %v516_v47 }
 0x2bd   : > { %v662_v51 = vmul.f32 -1.442695, %v511_v49  ;;  %v727_v52 = vpop.f32.mrb[6].mxu0 }
 0x2be   : > { %769 = vpow2.f32 %v663_v50  ;;  %v526_v53 = vadd.f32 %v727_v52, %v657_v45  ;;  %v520_v54 = vpop.f32.mrb[7].mxu0 }
 0x2bf   : > { %771 = vpow2.f32 %v662_v51  ;;  %v521_v55 = vadd.f32 %v657_v45, %v520_v54 }
 0x2c0   : > { %v665_v56 = vmul.f32 -1.442695, %v526_v53 }
 0x2c1   : > { %v664_v57 = vmul.f32 -1.442695, %v521_v55 }
 0x2c2   : > { %773 = vpow2.f32 %v665_v56 }
 0x2c3   : > { %775 = vpow2.f32 %v664_v57 }
 0x2c8   : > { %v770_v58 = vpop.eup %769 }
 0x2c9   : > { %v772_v59 = vpop.eup %771  ;;  %v542_v60 = vadd.f32 1.0, %v770_v58 }
 0x2ca   : > { %v541_v61 = vadd.f32 1.0, %v772_v59 }
 0x2cb   : > { %777 = vrcp.f32 %v542_v60 }
 0x2cc   : > { %v774_v62 = vpop.eup %773  ;;  %779 = vrcp.f32 %v541_v61 }
 0x2cd   : > { %v776_v63 = vpop.eup %775  ;;  %v544_v0 = vadd.f32 1.0, %v774_v62 }
 0x2ce   : > { %v543_v1 = vadd.f32 1.0, %v776_v63 }
 0x2cf   : > { %781 = vrcp.f32 %v544_v0 }
 0x2d0   : > { %783 = vrcp.f32 %v543_v1 }
 0x2d5   : > { %v778_v2 = vpop.eup %777 }
 0x2d6   : > { %v780_v3 = vpop.eup %779  ;;  %v554_v5 = vmul.f32 5.0, %v778_v2 }
 0x2d7   : > { %v553_v4 = vmul.f32 5.0, %v780_v3 }
 0x2d8   : > { %563 = vst.msk [vmem:[%s187_s18 + $0x8] sm:$0xff] %vm561_vm2, %v554_v5 }
 0x2d9   : > { %v782_v6 = vpop.eup %781  ;;  %562 = vst.msk [vmem:[%s187_s18] sm:$0xff] %vm561_vm2, %v553_v4 }
 0x2da   : > { %v784_v7 = vpop.eup %783  ;;  %v556_v9 = vmul.f32 5.0, %v782_v6 }
 0x2db   : > { %v555_v8 = vmul.f32 5.0, %v784_v7 }
 0x2dc   : > { %565 = vst.msk [vmem:[%s187_s18 + $0x18] sm:$0xff] %vm561_vm2, %v556_v9 }
 0x2dd   : > { %564 = vst.msk [vmem:[%s187_s18 + $0x10] sm:$0xff] %vm561_vm2, %v555_v8 }
 0x2de PF: > { %s14_s12 = sadd.s32 1, %s823_s12  }
 0x2df   : > { %p11_p3 = scmp.ge.s32.totalorder %s14_s12, 4  }
 0x2e1   :  { %13 = sbr.rel (!%p11_p3) target bundleno = 1 (0x1), region = 71 }
 0x2e8   :  { %588 = vsyncpa [#allocation3], 1 }
 0x2e9   :  { %590 = vsyncpa [#allocation3 + $0x1], 1 }

</bundles_post_ra>
